<compile_context>
chip_gen: v7x
topology: tpu7x:2x2x1
jax: 0.10.0
libtpu: 0.0.40
codegen_flags: <defaults>
</compile_context>

<pallas_src>
import functools
import math

import jax
import jax.numpy as jnp
from jax.experimental import pallas as pl
from jax.experimental.pallas import tpu as pltpu


_SQRT_2_OVER_PI = math.sqrt(2.0 / math.pi)


def _gelu_tanh(x):
    # tanh-approximate GELU (same formula as jax.nn.gelu(approximate=True)).
    # TODO(synk): torch F.gelu default is the exact erf-based GELU; the tanh
    # approximation (max abs err ~1e-3) is used because tanh lowers to the TPU
    # EUP on every Mosaic version, while erf lowering is not guaranteed.
    return 0.5 * x * (1.0 + jnp.tanh(_SQRT_2_OVER_PI * (x + 0.044715 * x * x * x)))


def mlp_kernel(seed_ref, x_ref, w1_ref, b1_ref, w2_ref, b2_ref, o_ref,
               *, dropout_p, training):
    # x_ref: (TM, D); w1: (D, H); b1: (1, H); w2: (H, D); b2: (1, D); o: (TM, D)
    x = x_ref[...]
    h = jnp.dot(x, w1_ref[...], preferred_element_type=jnp.float32) + b1_ref[...]
    h = _gelu_tanh(h)
    y = (jnp.dot(h.astype(w2_ref.dtype), w2_ref[...],
                 preferred_element_type=jnp.float32) + b2_ref[...])

    if training and dropout_p > 0.0:
        if dropout_p >= 1.0:
            y = jnp.zeros_like(y)
        else:
            # Seed once per grid step, one bits draw for the whole tile
            # (amortizes PRNG setup TM*D-fold vs. per-row seeding).
            pltpu.prng_seed(seed_ref[0] + pl.program_id(0))
            bits = pltpu.bitcast(pltpu.prng_random_bits(y.shape), jnp.uint32)
            thresh = jnp.uint32(dropout_p * 4294967295.0)
            keep = bits >= thresh
            y = jnp.where(keep, y * (1.0 / (1.0 - dropout_p)),
                          jnp.zeros_like(y))

    o_ref[...] = y.astype(o_ref.dtype)


def _round_up(x, m):
    return (x + m - 1) // m * m


def mlp_forward(x, w1, b1, w2, b2, *, dropout_p=0.0, training=False, seed=0,
                block_m=256):
    """x: (..., d_model); w1: (d_model, d_hidden); w2: (d_hidden, d_model).

    Weights are stored already-transposed relative to nn.Linear's
    (out_features, in_features) layout so the kernel does plain x @ W + b.
    """
    orig_shape = x.shape
    D = orig_shape[-1]
    H = w1.shape[1]
    assert w1.shape == (D, H) and w2.shape == (H, D)
    assert b1.shape == (H,) and b2.shape == (D,)

    x2 = x.reshape(-1, D)
    M = x2.shape[0]

    # Row-tile size: multiple of 8 (sublane), capped at block_m.
    tm = min(block_m, _round_up(M, 8))
    m_pad = _round_up(M, tm)
    if m_pad != M:
        x2 = jnp.pad(x2, ((0, m_pad - M), (0, 0)))

    kernel = functools.partial(mlp_kernel,
                               dropout_p=float(dropout_p),
                               training=bool(training))

    grid_spec = pltpu.PrefetchScalarGridSpec(
        num_scalar_prefetch=1,                     # dropout seed lives in SMEM
        grid=(m_pad // tm,),
        in_specs=[
            pl.BlockSpec((tm, D), lambda i, seed: (i, 0)),   # x row tile
            pl.BlockSpec((D, H), lambda i, seed: (0, 0)),    # W1 (VMEM-resident)
            pl.BlockSpec((1, H), lambda i, seed: (0, 0)),    # b1
            pl.BlockSpec((H, D), lambda i, seed: (0, 0)),    # W2 (VMEM-resident)
            pl.BlockSpec((1, D), lambda i, seed: (0, 0)),    # b2
        ],
        out_specs=pl.BlockSpec((tm, D), lambda i, seed: (i, 0)),
    )

    out = pl.pallas_call(
        kernel,
        out_shape=jax.ShapeDtypeStruct((m_pad, D), x.dtype),
        grid_spec=grid_spec,
        compiler_params=pltpu.CompilerParams(
            dimension_semantics=("parallel",)),    # lets v7x shard across 2 TCs
    )(jnp.array([seed], dtype=jnp.int32),
      x2, w1, b1.reshape(1, H), w2, b2.reshape(1, D))

    return out[:M].reshape(orig_shape)


if __name__ == "__main__":
    # Module hyper-params (small but lane-dense: d_model multiple of 128).
    d_model, d_mlp = 128, 4
    dropout_p = 0.1
    B, T = 2, 8
    H = d_model * d_mlp

    key = jax.random.PRNGKey(0)
    kx, kw1, kb1, kw2, kb2 = jax.random.split(key, 5)

    # nn.Linear default init: U(-1/sqrt(fan_in), 1/sqrt(fan_in))
    lim1 = 1.0 / math.sqrt(d_model)
    lim2 = 1.0 / math.sqrt(H)
    x = jax.random.normal(kx, (B, T, d_model), dtype=jnp.float32)
    w1 = jax.random.uniform(kw1, (d_model, H), jnp.float32, -lim1, lim1)
    b1 = jax.random.uniform(kb1, (H,), jnp.float32, -lim1, lim1)
    w2 = jax.random.uniform(kw2, (H, d_model), jnp.float32, -lim2, lim2)
    b2 = jax.random.uniform(kb2, (d_model,), jnp.float32, -lim2, lim2)

    # Eval-mode forward (nn.Dropout is identity in eval); train-mode dropout is
    # implemented in-kernel via the TPU PRNG (set training=True to exercise it).
    out = mlp_forward(x, w1, b1, w2, b2, dropout_p=dropout_p, training=False)
    out = jax.block_until_ready(out)

    # Pure-JAX reference (eval semantics), high-precision matmuls.
    hp = jax.lax.Precision.HIGHEST
    h_ref = _gelu_tanh(
        jnp.einsum("nd,dh->nh", x.reshape(-1, d_model), w1, precision=hp) + b1)
    ref = (jnp.einsum("nh,hd->nd", h_ref, w2, precision=hp) + b2).reshape(
        B, T, d_model)

    assert out.shape == (B, T, d_model)
    assert jnp.allclose(out, ref, atol=5e-3, rtol=5e-3), "mismatch vs reference"

    print("KERNEL_OK")
</pallas_src>

<mosaic_0001>
module attributes {stable_mosaic.version = 11 : i64} {
  func.func @mlp_kernel(%arg0: i32, %arg1: memref<1xi32, #tpu.memory_space<smem>>, %arg2: memref<16x128xf32, #tpu.memory_space<vmem>>, %arg3: memref<128x512xf32, #tpu.memory_space<vmem>>, %arg4: memref<1x512xf32, #tpu.memory_space<vmem>>, %arg5: memref<512x128xf32, #tpu.memory_space<vmem>>, %arg6: memref<1x128xf32, #tpu.memory_space<vmem>>, %arg7: memref<16x128xf32, #tpu.memory_space<vmem>>) attributes {dimension_semantics = [#tpu.dimension_semantics<parallel>], iteration_bounds = array<i64: 1>, scalar_prefetch = 1 : i64, scratch_operands = 0 : i64, tpu.core_type = #tpu.core_type<tc>, window_params = [{transform_indices = @transform_0, window_bounds = array<i64: 16, 128>}, {pipeline_mode = #tpu.pipeline_mode<synchronous>, transform_indices = @transform_1, window_bounds = array<i64: 128, 512>}, {pipeline_mode = #tpu.pipeline_mode<synchronous>, transform_indices = @transform_2, window_bounds = array<i64: 1, 512>}, {pipeline_mode = #tpu.pipeline_mode<synchronous>, transform_indices = @transform_3, window_bounds = array<i64: 512, 128>}, {pipeline_mode = #tpu.pipeline_mode<synchronous>, transform_indices = @transform_4, window_bounds = array<i64: 1, 128>}, {transform_indices = @transform_5, window_bounds = array<i64: 16, 128>}]} {
    %c0 = arith.constant 0 : index
    %c0_0 = arith.constant 0 : index
    %0 = vector.load %arg2[%c0, %c0_0] : memref<16x128xf32, #tpu.memory_space<vmem>>, vector<16x128xf32>
    %c0_1 = arith.constant 0 : index
    %c0_2 = arith.constant 0 : index
    %1 = vector.load %arg3[%c0_1, %c0_2] : memref<128x512xf32, #tpu.memory_space<vmem>>, vector<128x512xf32>
    %cst = arith.constant dense<0.000000e+00> : vector<16x512xf32>
    %2 = tpu.matmul %0, %1, %cst {dimension_numbers = #tpu.dot_dimension_numbers<[1], [0], [0], [1], [0, 0, 1, 1], [], []>} : vector<16x128xf32>, vector<128x512xf32>, vector<16x512xf32> -> vector<16x512xf32>
    %c0_3 = arith.constant 0 : index
    %c0_4 = arith.constant 0 : index
    %3 = vector.load %arg4[%c0_3, %c0_4] : memref<1x512xf32, #tpu.memory_space<vmem>>, vector<1x512xf32>
    %4 = vector.broadcast %3 : vector<1x512xf32> to vector<16x512xf32>
    %5 = arith.addf %2, %4 : vector<16x512xf32>
    %cst_5 = arith.constant 5.000000e-01 : f32
    %6 = vector.broadcast %cst_5 : f32 to vector<16x512xf32>
    %7 = arith.mulf %6, %5 : vector<16x512xf32>
    %cst_6 = arith.constant 4.471500e-02 : f32
    %8 = vector.broadcast %cst_6 : f32 to vector<16x512xf32>
    %9 = arith.mulf %8, %5 : vector<16x512xf32>
    %10 = arith.mulf %9, %5 : vector<16x512xf32>
    %11 = arith.mulf %10, %5 : vector<16x512xf32>
    %12 = arith.addf %5, %11 : vector<16x512xf32>
    %cst_7 = arith.constant 0.797884583 : f32
    %13 = vector.broadcast %cst_7 : f32 to vector<16x512xf32>
    %14 = arith.mulf %13, %12 : vector<16x512xf32>
    %15 = math.tanh %14 : vector<16x512xf32>
    %cst_8 = arith.constant 1.000000e+00 : f32
    %16 = vector.broadcast %cst_8 : f32 to vector<16x512xf32>
    %17 = arith.addf %16, %15 : vector<16x512xf32>
    %18 = arith.mulf %7, %17 : vector<16x512xf32>
    %c0_9 = arith.constant 0 : index
    %c0_10 = arith.constant 0 : index
    %19 = vector.load %arg5[%c0_9, %c0_10] : memref<512x128xf32, #tpu.memory_space<vmem>>, vector<512x128xf32>
    %cst_11 = arith.constant dense<0.000000e+00> : vector<16x128xf32>
    %20 = tpu.matmul %18, %19, %cst_11 {dimension_numbers = #tpu.dot_dimension_numbers<[1], [0], [0], [1], [0, 0, 1, 1], [], []>} : vector<16x512xf32>, vector<512x128xf32>, vector<16x128xf32> -> vector<16x128xf32>
    %c0_12 = arith.constant 0 : index
    %c0_13 = arith.constant 0 : index
    %21 = vector.load %arg6[%c0_12, %c0_13] : memref<1x128xf32, #tpu.memory_space<vmem>>, vector<1x128xf32>
    %22 = vector.broadcast %21 : vector<1x128xf32> to vector<16x128xf32>
    %23 = arith.addf %20, %22 : vector<16x128xf32>
    %c0_14 = arith.constant 0 : index
    %c0_15 = arith.constant 0 : index
    %24 = vector.load %arg7[%c0_14, %c0_15] : memref<16x128xf32, #tpu.memory_space<vmem>>, vector<16x128xf32>
    tpu.vector_store %arg7[%c0_14, %c0_15], %23 {strides = array<i32>} : memref<16x128xf32, #tpu.memory_space<vmem>>, vector<16x128xf32>,
    return
  }
  func.func @transform_0(%arg0: i32, %arg1: memref<1xi32, #tpu.memory_space<smem>>) -> (i32, i32) {
    %c0_i32 = arith.constant 0 : i32
    %c0_i32_0 = arith.constant 0 : i32
    return %arg0, %c0_i32 : i32, i32
  }
  func.func @transform_1(%arg0: i32, %arg1: memref<1xi32, #tpu.memory_space<smem>>) -> (i32, i32) {
    %c0_i32 = arith.constant 0 : i32
    %c0_i32_0 = arith.constant 0 : i32
    %c0_i32_1 = arith.constant 0 : i32
    return %c0_i32, %c0_i32_0 : i32, i32
  }
  func.func @transform_2(%arg0: i32, %arg1: memref<1xi32, #tpu.memory_space<smem>>) -> (i32, i32) {
    %c0_i32 = arith.constant 0 : i32
    %c0_i32_0 = arith.constant 0 : i32
    %c0_i32_1 = arith.constant 0 : i32
    return %c0_i32, %c0_i32_0 : i32, i32
  }
  func.func @transform_3(%arg0: i32, %arg1: memref<1xi32, #tpu.memory_space<smem>>) -> (i32, i32) {
    %c0_i32 = arith.constant 0 : i32
    %c0_i32_0 = arith.constant 0 : i32
    %c0_i32_1 = arith.constant 0 : i32
    return %c0_i32, %c0_i32_0 : i32, i32
  }
  func.func @transform_4(%arg0: i32, %arg1: memref<1xi32, #tpu.memory_space<smem>>) -> (i32, i32) {
    %c0_i32 = arith.constant 0 : i32
    %c0_i32_0 = arith.constant 0 : i32
    %c0_i32_1 = arith.constant 0 : i32
    return %c0_i32, %c0_i32_0 : i32, i32
  }
  func.func @transform_5(%arg0: i32, %arg1: memref<1xi32, #tpu.memory_space<smem>>) -> (i32, i32) {
    %c0_i32 = arith.constant 0 : i32
    %c0_i32_0 = arith.constant 0 : i32
    return %arg0, %c0_i32 : i32, i32
  }
}

</mosaic_0001>

<bundles_post_ra>
// kernel: tpu_custom_call.1
= control target key start
LH: loop header
LB: loop body
LE: loop exit
PB: predicated region body
PF: predicated region fallthrough
CT: control target
= control target key end

     0   :  { %12 = vsyncpa [#allocation5], 0  ;;  %s1089_s0 = inlined_call_operand.<no memory space> [shape: s32[1], index: 0, kind: input, shape index: {}]   ;;  %s1090_s1 = inlined_call_operand.hbm [shape: f32[16,128], index: 1, kind: input, shape index: {}]   ;;  %s1091_s2 = inlined_call_operand.hbm [shape: f32[128,512], index: 2, kind: input, shape index: {}]   ;;  %s1092_s3 = inlined_call_operand.vmem [shape: f32[1,512], index: 3, kind: input, shape index: {}]   ;;  %s1093_s4 = inlined_call_operand.hbm [shape: f32[512,128], index: 4, kind: input, shape index: {}]   ;;  %s1094_s5 = inlined_call_operand.vmem [shape: f32[1,128], index: 5, kind: input, shape index: {}]   ;;  %s1095_s6 = inlined_call_operand.hbm [shape: f32[16,128], index: 6, kind: output, shape index: {}]  }
   0x1   :  { %13 = vsyncpa [#allocation8], 0 }
   0x2   :  { %14 = vsyncpa [#allocation6], 0  ;;  %s943_s0 = smov [#allocation7]   ;;  %s849_s24 = scalar_lea.hbm %s1091_s2, 8192 }
   0x3   :  { %s32_s21 = sshll.u32 %s943_s0, 4  ;;  %p850_p0 = scmp.ne.s32.totalorder %s1091_s2, %s849_s24  ;;  %s33_s21 = int_to_ptr.vmem [resolvable:$true] %s32_s21 }
   0x4   :  { %p853_p1 = scmp.lt.u32.totalorder %s849_s24, %s1091_s2 }
   0x6   :  { %p855_p2 = pnand %p853_p1, %p850_p0 }
   0x8   :  { %858 = shalt.err (!%p855_p2)
}
   0x9   :  { %s859_s29 = scalar_lea.vmem %s33_s21, 8192  ;;  %p864_p4 = scmp.lt.s32.totalorder %s33_s21, %s33_s21 }
   0xa   :  { %p860_p3 = scmp.ne.s32.totalorder %s33_s21, %s859_s29  ;;  %p865_p5 = scmp.lt.s32.totalorder %s859_s29, %s859_s29 }
   0xc   :  { %p866_p6 = por %p865_p5, %p864_p4 }
   0xe   :  { %p867_p7 = pnand %p866_p6, %p860_p3 }
  0x10   :  { %870 = shalt.err (!%p867_p7)
}
  0x11   :  { %s944_s30 = smov 512   ;;  %s945_s7 = smov 32  }
  0x12   :  { %38 = dma.hbm_to_vmem [thread:$0]  %s1091_s2, 8192, %s33_s21, [#allocation8], %s944_s30, %s944_s30, %s945_s7  }
  0x13   :  { %s946_s10 = smov [#allocation4]   ;;  %s871_s14 = scalar_lea.hbm %s1090_s1, 256 }
  0x14   :  { %s20_s11 = sshll.u32 %s946_s10, 4  ;;  %p872_p8 = scmp.ne.s32.totalorder %s1090_s1, %s871_s14  ;;  %s21_s11 = int_to_ptr.vmem [resolvable:$true] %s20_s11 }
  0x15   :  { %p875_p9 = scmp.lt.u32.totalorder %s871_s14, %s1090_s1 }
  0x17   :  { %p877_p10 = pnand %p875_p9, %p872_p8 }
  0x19   :  { %880 = shalt.err (!%p877_p10)
}
  0x1a   :  { %s881_s19 = scalar_lea.vmem %s21_s11, 256  ;;  %p886_p12 = scmp.lt.s32.totalorder %s21_s11, %s21_s11 }
  0x1b   :  { %p882_p11 = scmp.ne.s32.totalorder %s21_s11, %s881_s19  ;;  %p887_p13 = scmp.lt.s32.totalorder %s881_s19, %s881_s19 }
  0x1d   :  { %p888_p0 = por %p887_p13, %p886_p12 }
  0x1f   :  { %p889_p1 = pnand %p888_p0, %p882_p11 }
  0x21   :  { %892 = shalt.err (!%p889_p1)
}
  0x22   :  { %s947_s2 = smov 128   ;;  %s948_s20 = smov 8  }
  0x23   :  { %26 = dma.hbm_to_vmem [thread:$0]  %s1090_s1, 256, %s21_s11, [#allocation5], %s947_s2, %s947_s2, %s948_s20  }
  0x24   :  { %s949_s22 = smov [#allocation9]   ;;  %s893_s26 = scalar_lea.hbm %s1093_s4, 8192 }
  0x25   :  { %s46_s23 = sshll.u32 %s949_s22, 4  ;;  %p894_p2 = scmp.ne.s32.totalorder %s1093_s4, %s893_s26  ;;  %s47_s23 = int_to_ptr.vmem [resolvable:$true] %s46_s23 }
  0x26   :  { %p897_p3 = scmp.lt.u32.totalorder %s893_s26, %s1093_s4 }
  0x28   :  { %p899_p4 = pnand %p897_p3, %p894_p2 }
  0x2a   :  { %902 = shalt.err (!%p899_p4)
}
  0x2b   :  { %s903_s7 = scalar_lea.vmem %s47_s23, 8192  ;;  %p908_p6 = scmp.lt.s32.totalorder %s47_s23, %s47_s23 }
  0x2c   :  { %p904_p5 = scmp.ne.s32.totalorder %s47_s23, %s903_s7  ;;  %p909_p7 = scmp.lt.s32.totalorder %s903_s7, %s903_s7 }
  0x2e   :  { %p910_p8 = por %p909_p7, %p908_p6 }
  0x30   :  { %p911_p9 = pnand %p910_p8, %p904_p5 }
  0x32   :  { %914 = shalt.err (!%p911_p9)
}
  0x33   :  { %52 = dma.hbm_to_vmem [thread:$0]  %s1093_s4, 8192, %s47_s23, [#allocation8], %s947_s2, %s947_s2, %s948_s20  }
  0x34   :  { %937 = dma.done.wait [#allocation5], 256  }
  0x35   :  { %938 = vsyncadd [#allocation5], 4294967040 }
  0x36   :  { %939 = dma.done.wait [#allocation8], 16384  }
  0x37   :  { %940 = vsyncadd [#allocation8], 4294950912  ;;  %v950_v0 = vmov 0.0   ;;  %v67_v1 = vld [vmem:[#allocation7 + $0x8] sm:$0xff]  ;;  %v69_v3 = vld [vmem:[#allocation7 + $0x18] sm:$0xff]  ;;  %s951_s11 = smov [#allocation10]  }
  0x38   :  { %216 = vmatprep.mubr.f32.mxu0 %v950_v0  ;;  %293 = vmatprep.mubr.f32.mxu1 %v950_v0  ;;  %v71_v2 = vld [vmem:[#allocation7 + $0x28] sm:$0xff]  ;;  %v73_v5 = vld [vmem:[#allocation7 + $0x38] sm:$0xff]  ;;  %v66_v6 = vld [vmem:[#allocation7] sm:$0xff]  ;;  %s606_s12 = sshll.u32 %s951_s11, 4  ;;  %s607_s12 = int_to_ptr.vmem [resolvable:$true] %s606_s12 }
  0x39   :  { %v696_v4 = vpack.c.bf16 %v71_v2, %v67_v1  ;;  %v70_v7 = vld [vmem:[#allocation7 + $0x20] sm:$0xff]  ;;  %v728_v8 = vpack.c.bf16 %v73_v5, %v69_v3  ;;  %v68_v10 = vld [vmem:[#allocation7 + $0x10] sm:$0xff]  ;;  %v75_v12 = vld [vmem:[#allocation7 + $0x48] sm:$0xff]  ;;  %p920_p11 = scmp.lt.s32.totalorder %s607_s12, %s607_s12 }
  0x3a   :  { %v698_v9 = vpack.c.bf16 %v70_v7, %v66_v6  ;;  %v72_v11 = vld [vmem:[#allocation7 + $0x30] sm:$0xff]  ;;  %v79_v14 = vld [vmem:[#allocation7 + $0x68] sm:$0xff]  ;;  %v77_v15 = vld [vmem:[#allocation7 + $0x58] sm:$0xff] }
  0x3b   :  { %697 = vmatprep.subr.bf16.mxu0 %v696_v4  ;;  %v730_v13 = vpack.c.bf16 %v72_v11, %v68_v10  ;;  %v81_v16 = vld [vmem:[#allocation7 + $0x78] sm:$0xff]  ;;  %729 = vmatprep.subr.bf16.mxu1 %v728_v8  ;;  %v700_v17 = vpack.c.bf16 %v79_v14, %v75_v12  ;;  %v74_v19 = vld [vmem:[#allocation7 + $0x40] sm:$0xff]  ;;  %v76_v21 = vld [vmem:[#allocation7 + $0x50] sm:$0xff] }
  0x3c   :  { %699 = vmatpush1.bf16.msra.mxu0 %v698_v9  ;;  %v732_v18 = vpack.c.bf16 %v81_v16, %v77_v15  ;;  %v78_v20 = vld [vmem:[#allocation7 + $0x60] sm:$0xff]  ;;  %v80_v23 = vld [vmem:[#allocation7 + $0x70] sm:$0xff]  ;;  %v83_v24 = vld [vmem:[#allocation7 + $0x88] sm:$0xff] }
  0x3d   :  { %731 = vmatpush1.bf16.msra.mxu1 %v730_v13  ;;  %v702_v22 = vpack.c.bf16 %v78_v20, %v74_v19  ;;  %v87_v25 = vld [vmem:[#allocation7 + $0xa8] sm:$0xff]  ;;  %701 = vmatprep.subr.bf16.mxu0 %v700_v17  ;;  %v734_v26 = vpack.c.bf16 %v80_v23, %v76_v21  ;;  %v85_v28 = vld [vmem:[#allocation7 + $0x98] sm:$0xff]  ;;  %v82_v30 = vld [vmem:[#allocation7 + $0x80] sm:$0xff] }
  0x3e   :  { %733 = vmatprep.subr.bf16.mxu1 %v732_v18  ;;  %v704_v27 = vpack.c.bf16 %v87_v25, %v83_v24  ;;  %v89_v29 = vld [vmem:[#allocation7 + $0xb8] sm:$0xff]  ;;  %v86_v32 = vld [vmem:[#allocation7 + $0xa0] sm:$0xff]  ;;  %v84_v33 = vld [vmem:[#allocation7 + $0x90] sm:$0xff] }
  0x3f   :  { %v736_v31 = vpack.c.bf16 %v89_v29, %v85_v28  ;;  %v88_v34 = vld [vmem:[#allocation7 + $0xb0] sm:$0xff]  ;;  %v706_v35 = vpack.c.bf16 %v86_v32, %v82_v30  ;;  %v91_v36 = vld [vmem:[#allocation7 + $0xc8] sm:$0xff]  ;;  %v93_v38 = vld [vmem:[#allocation7 + $0xd8] sm:$0xff] }
  0x40   :  { %703 = vmatpush1.bf16.msra.mxu0 %v702_v22  ;;  %v95_v37 = vld [vmem:[#allocation7 + $0xe8] sm:$0xff]  ;;  %v738_v39 = vpack.c.bf16 %v88_v34, %v84_v33  ;;  %v97_v41 = vld [vmem:[#allocation7 + $0xf8] sm:$0xff]  ;;  %v90_v42 = vld [vmem:[#allocation7 + $0xc0] sm:$0xff] }
  0x41   :  { %735 = vmatpush1.bf16.msra.mxu1 %v734_v26  ;;  %705 = vmatprep.subr.bf16.mxu0 %v704_v27  ;;  %v708_v40 = vpack.c.bf16 %v95_v37, %v91_v36  ;;  %v94_v43 = vld [vmem:[#allocation7 + $0xe0] sm:$0xff]  ;;  %v740_v44 = vpack.c.bf16 %v97_v41, %v93_v38  ;;  %v92_v45 = vld [vmem:[#allocation7 + $0xd0] sm:$0xff]  ;;  %v99_v47 = vld [vmem:[#allocation7 + $0x108] sm:$0xff] }
  0x42   :  { %737 = vmatprep.subr.bf16.mxu1 %v736_v31  ;;  %v96_v46 = vld [vmem:[#allocation7 + $0xf0] sm:$0xff]  ;;  %v103_v48 = vld [vmem:[#allocation7 + $0x128] sm:$0xff]  ;;  %v101_v49 = vld [vmem:[#allocation7 + $0x118] sm:$0xff]  ;;  %v710_v51 = vpack.c.bf16 %v94_v43, %v90_v42 }
  0x43   :  { %v105_v50 = vld [vmem:[#allocation7 + $0x138] sm:$0xff]  ;;  %v742_v52 = vpack.c.bf16 %v96_v46, %v92_v45  ;;  %v712_v53 = vpack.c.bf16 %v103_v48, %v99_v47  ;;  %v98_v54 = vld [vmem:[#allocation7 + $0x100] sm:$0xff]  ;;  %v100_v56 = vld [vmem:[#allocation7 + $0x110] sm:$0xff] }
  0x44   :  { %707 = vmatpush1.bf16.msra.mxu0 %v706_v35  ;;  %v102_v55 = vld [vmem:[#allocation7 + $0x120] sm:$0xff]  ;;  %v744_v57 = vpack.c.bf16 %v105_v50, %v101_v49  ;;  %v104_v58 = vld [vmem:[#allocation7 + $0x130] sm:$0xff]  ;;  %v107_v59 = vld [vmem:[#allocation7 + $0x148] sm:$0xff] }
  0x45   :  { %739 = vmatpush1.bf16.msra.mxu1 %v738_v39  ;;  %709 = vmatprep.subr.bf16.mxu0 %v708_v40  ;;  %v111_v60 = vld [vmem:[#allocation7 + $0x168] sm:$0xff]  ;;  %v109_v61 = vld [vmem:[#allocation7 + $0x158] sm:$0xff]  ;;  %v714_v63 = vpack.c.bf16 %v102_v55, %v98_v54  ;;  %v746_v1 = vpack.c.bf16 %v104_v58, %v100_v56  ;;  %v106_v3 = vld [vmem:[#allocation7 + $0x140] sm:$0xff] }
  0x46   :  { %741 = vmatprep.subr.bf16.mxu1 %v740_v44  ;;  %v113_v62 = vld [vmem:[#allocation7 + $0x178] sm:$0xff]  ;;  %v716_v2 = vpack.c.bf16 %v111_v60, %v107_v59  ;;  %v110_v4 = vld [vmem:[#allocation7 + $0x160] sm:$0xff]  ;;  %v108_v5 = vld [vmem:[#allocation7 + $0x150] sm:$0xff] }
  0x47   :  { %v748_v6 = vpack.c.bf16 %v113_v62, %v109_v61  ;;  %v112_v7 = vld [vmem:[#allocation7 + $0x170] sm:$0xff]  ;;  %v115_v8 = vld [vmem:[#allocation7 + $0x188] sm:$0xff]  ;;  %v117_v10 = vld [vmem:[#allocation7 + $0x198] sm:$0xff]  ;;  %v718_v12 = vpack.c.bf16 %v110_v4, %v106_v3 }
  0x48   :  { %711 = vmatpush1.bf16.msra.mxu0 %v710_v51  ;;  %v119_v9 = vld [vmem:[#allocation7 + $0x1a8] sm:$0xff]  ;;  %v121_v11 = vld [vmem:[#allocation7 + $0x1b8] sm:$0xff]  ;;  %v750_v13 = vpack.c.bf16 %v112_v7, %v108_v5  ;;  %v114_v15 = vld [vmem:[#allocation7 + $0x180] sm:$0xff] }
  0x49   :  { %743 = vmatpush1.bf16.msra.mxu1 %v742_v52  ;;  %713 = vmatprep.subr.bf16.mxu0 %v712_v53  ;;  %v720_v14 = vpack.c.bf16 %v119_v9, %v115_v8  ;;  %v118_v16 = vld [vmem:[#allocation7 + $0x1a0] sm:$0xff]  ;;  %v116_v17 = vld [vmem:[#allocation7 + $0x190] sm:$0xff]  ;;  %v752_v18 = vpack.c.bf16 %v121_v11, %v117_v10  ;;  %v123_v20 = vld [vmem:[#allocation7 + $0x1c8] sm:$0xff] }
  0x4a   :  { %745 = vmatprep.subr.bf16.mxu1 %v744_v57  ;;  %v120_v19 = vld [vmem:[#allocation7 + $0x1b0] sm:$0xff]  ;;  %v127_v21 = vld [vmem:[#allocation7 + $0x1e8] sm:$0xff]  ;;  %v125_v22 = vld [vmem:[#allocation7 + $0x1d8] sm:$0xff]  ;;  %v722_v24 = vpack.c.bf16 %v118_v16, %v114_v15 }
  0x4b   :  { %v129_v23 = vld [vmem:[#allocation7 + $0x1f8] sm:$0xff]  ;;  %v754_v25 = vpack.c.bf16 %v120_v19, %v116_v17  ;;  %v724_v26 = vpack.c.bf16 %v127_v21, %v123_v20  ;;  %v122_v27 = vld [vmem:[#allocation7 + $0x1c0] sm:$0xff]  ;;  %v124_v29 = vld [vmem:[#allocation7 + $0x1d0] sm:$0xff] }
  0x4c   :  { %715 = vmatpush1.bf16.msra.mxu0 %v714_v63  ;;  %v126_v28 = vld [vmem:[#allocation7 + $0x1e0] sm:$0xff]  ;;  %v756_v30 = vpack.c.bf16 %v129_v23, %v125_v22  ;;  %v128_v31 = vld [vmem:[#allocation7 + $0x1f0] sm:$0xff]  ;;  %v395_v33 = vld [vmem:[#allocation9 + $0x88] sm:$0xff] }
  0x4d   :  { %747 = vmatpush1.bf16.msra.mxu1 %v746_v1  ;;  %717 = vmatprep.subr.bf16.mxu0 %v716_v2  ;;  %v394_v32 = vld [vmem:[#allocation9 + $0x80] sm:$0xff]  ;;  %v427_v35 = vld [vmem:[#allocation9 + $0x188] sm:$0xff]  ;;  %v726_v36 = vpack.c.bf16 %v126_v28, %v122_v27  ;;  %v758_v37 = vpack.c.bf16 %v128_v31, %v124_v29  ;;  %v64_v44 = vld [vmem:[#allocation4] sm:$0xff] }
  0x4e   :  { %749 = vmatprep.subr.bf16.mxu1 %v748_v6  ;;  %v426_v34 = vld [vmem:[#allocation9 + $0x180] sm:$0xff]  ;;  %v760_v38 = vpack.c.bf16 %v395_v33, %v394_v32  ;;  %v379_v41 = vld [vmem:[#allocation9 + $0x8] sm:$0xff]  ;;  %v65_v47 = vld [vmem:[#allocation4 + $0x8] sm:$0xff] }
  0x4f   :  { %v792_v39 = vpack.c.bf16 %v427_v35, %v426_v34  ;;  %v378_v40 = vld [vmem:[#allocation9] sm:$0xff]  ;;  %v411_v43 = vld [vmem:[#allocation9 + $0x108] sm:$0xff]  ;;  %v396_v48 = vld [vmem:[#allocation9 + $0x90] sm:$0xff] }
  0x50   :  { %719 = vmatpush1.bf16.msra.mxu0 %v718_v12  ;;  %v410_v42 = vld [vmem:[#allocation9 + $0x100] sm:$0xff]  ;;  %v762_v45 = vpack.c.bf16 %v379_v41, %v378_v40  ;;  %v397_v49 = vld [vmem:[#allocation9 + $0x98] sm:$0xff]  ;;  %v428_v50 = vld [vmem:[#allocation9 + $0x190] sm:$0xff] }
  0x51   :  { %751 = vmatpush1.bf16.msra.mxu1 %v750_v13  ;;  %721 = vmatprep.subr.bf16.mxu0 %v720_v14  ;;  %v794_v46 = vpack.c.bf16 %v411_v43, %v410_v42  ;;  %v764_v51 = vpack.c.bf16 %v397_v49, %v396_v48  ;;  %v429_v52 = vld [vmem:[#allocation9 + $0x198] sm:$0xff]  ;;  %v380_v53 = vld [vmem:[#allocation9 + $0x10] sm:$0xff]  ;;  %v399_v60 = vld [vmem:[#allocation9 + $0xa8] sm:$0xff] }
  0x52   :  { %753 = vmatprep.subr.bf16.mxu1 %v752_v18  ;;  %v381_v54 = vld [vmem:[#allocation9 + $0x18] sm:$0xff]  ;;  %v796_v55 = vpack.c.bf16 %v429_v52, %v428_v50  ;;  %v412_v57 = vld [vmem:[#allocation9 + $0x110] sm:$0xff]  ;;  %v430_v61 = vld [vmem:[#allocation9 + $0x1a0] sm:$0xff] }
  0x53   :  { %v766_v56 = vpack.c.bf16 %v381_v54, %v380_v53  ;;  %v413_v58 = vld [vmem:[#allocation9 + $0x118] sm:$0xff]  ;;  %v431_v63 = vld [vmem:[#allocation9 + $0x1a8] sm:$0xff]  ;;  %v382_v1 = vld [vmem:[#allocation9 + $0x20] sm:$0xff] }
  0x54   :  { %723 = vmatpush1.bf16.msra.mxu0 %v722_v24  ;;  %v798_v59 = vpack.c.bf16 %v413_v58, %v412_v57  ;;  %v383_v2 = vld [vmem:[#allocation9 + $0x28] sm:$0xff]  ;;  %v800_v3 = vpack.c.bf16 %v431_v63, %v430_v61  ;;  %v414_v5 = vld [vmem:[#allocation9 + $0x120] sm:$0xff]  ;;  %v400_v8 = vld [vmem:[#allocation9 + $0xb0] sm:$0xff] }
  0x55   :  { %755 = vmatpush1.bf16.msra.mxu1 %v754_v25  ;;  %725 = vmatprep.subr.bf16.mxu0 %v724_v26  ;;  %v770_v4 = vpack.c.bf16 %v383_v2, %v382_v1  ;;  %v415_v6 = vld [vmem:[#allocation9 + $0x128] sm:$0xff]  ;;  %v401_v9 = vld [vmem:[#allocation9 + $0xb8] sm:$0xff]  ;;  %v432_v10 = vld [vmem:[#allocation9 + $0x1b0] sm:$0xff] }
  0x56   :  { %757 = vmatprep.subr.bf16.mxu1 %v756_v30  ;;  %v802_v7 = vpack.c.bf16 %v415_v6, %v414_v5  ;;  %v772_v11 = vpack.c.bf16 %v401_v9, %v400_v8  ;;  %v433_v12 = vld [vmem:[#allocation9 + $0x1b8] sm:$0xff]  ;;  %v384_v13 = vld [vmem:[#allocation9 + $0x30] sm:$0xff]  ;;  %v402_v20 = vld [vmem:[#allocation9 + $0xc0] sm:$0xff] }
  0x57   :  { %v385_v14 = vld [vmem:[#allocation9 + $0x38] sm:$0xff]  ;;  %v804_v15 = vpack.c.bf16 %v433_v12, %v432_v10  ;;  %v416_v17 = vld [vmem:[#allocation9 + $0x130] sm:$0xff]  ;;  %v403_v21 = vld [vmem:[#allocation9 + $0xc8] sm:$0xff] }
  0x58   :  { %727 = vmatpush1.bf16.msra.mxu0 %v726_v36  ;;  %v774_v16 = vpack.c.bf16 %v385_v14, %v384_v13  ;;  %v417_v18 = vld [vmem:[#allocation9 + $0x138] sm:$0xff]  ;;  %v434_v22 = vld [vmem:[#allocation9 + $0x1c0] sm:$0xff]  ;;  %v776_v23 = vpack.c.bf16 %v403_v21, %v402_v20  ;;  %v435_v24 = vld [vmem:[#allocation9 + $0x1c8] sm:$0xff] }
  0x59   :  { %759 = vmatpush1.bf16.msra.mxu1 %v758_v37  ;;  %761 = vmatprep.subr.bf16.mxu0 %v760_v38  ;;  %v806_v19 = vpack.c.bf16 %v417_v18, %v416_v17  ;;  %v386_v25 = vld [vmem:[#allocation9 + $0x40] sm:$0xff]  ;;  %v387_v26 = vld [vmem:[#allocation9 + $0x48] sm:$0xff]  ;;  %v808_v27 = vpack.c.bf16 %v435_v24, %v434_v22  ;;  %v404_v31 = vld [vmem:[#allocation9 + $0xd0] sm:$0xff] }
  0x5a   :  { %793 = vmatprep.subr.bf16.mxu1 %v792_v39  ;;  %v778_v28 = vpack.c.bf16 %v387_v26, %v386_v25  ;;  %v418_v29 = vld [vmem:[#allocation9 + $0x140] sm:$0xff]  ;;  %v419_v30 = vld [vmem:[#allocation9 + $0x148] sm:$0xff]  ;;  %v405_v33 = vld [vmem:[#allocation9 + $0xd8] sm:$0xff] }
  0x5b   :  { %217 = vmatmul.mubr.f32.vlgmr.msra.gmra.mrb[0].mxu0 %v64_v44  ;;  %v810_v32 = vpack.c.bf16 %v419_v30, %v418_v29  ;;  %v436_v34 = vld [vmem:[#allocation9 + $0x1d0] sm:$0xff]  ;;  %v437_v35 = vld [vmem:[#allocation9 + $0x1d8] sm:$0xff]  ;;  %v780_v36 = vpack.c.bf16 %v405_v33, %v404_v31  ;;  %v406_v43 = vld [vmem:[#allocation9 + $0xe0] sm:$0xff] }
  0x5c   :  { %294 = vmatmul.mubr.f32.vlgmr.msra.gmra.mrb[0].mxu1 %v64_v44  ;;  %222 = vmatprep.mubr.f32.mxu0 %v950_v0  ;;  %v812_v37 = vpack.c.bf16 %v437_v35, %v436_v34  ;;  %v388_v38 = vld [vmem:[#allocation9 + $0x50] sm:$0xff]  ;;  %v389_v39 = vld [vmem:[#allocation9 + $0x58] sm:$0xff]  ;;  %v407_v44 = vld [vmem:[#allocation9 + $0xe8] sm:$0xff] }
  0x5d   :  { %299 = vmatprep.mubr.f32.mxu1 %v950_v0  ;;  %763 = vmatpush3.bf16.msra.mxu0 %v762_v45  ;;  %v398_v0 = vld [vmem:[#allocation9 + $0xa0] sm:$0xff]  ;;  %v420_v40 = vld [vmem:[#allocation9 + $0x150] sm:$0xff]  ;;  %v782_v41 = vpack.c.bf16 %v389_v39, %v388_v38  ;;  %v421_v42 = vld [vmem:[#allocation9 + $0x158] sm:$0xff] }
  0x5e   :  { %795 = vmatpush3.bf16.msra.mxu1 %v794_v46  ;;  %765 = vmatprep.subr.bf16.mxu0 %v764_v51  ;;  %v768_v62 = vpack.c.bf16 %v399_v60, %v398_v0  ;;  %v814_v45 = vpack.c.bf16 %v421_v42, %v420_v40  ;;  %v784_v46 = vpack.c.bf16 %v407_v44, %v406_v43  ;;  %v439_v48 = vld [vmem:[#allocation9 + $0x1e8] sm:$0xff]  ;;  %v390_v49 = vld [vmem:[#allocation9 + $0x60] sm:$0xff]  ;;  %v440_v57 = vld [vmem:[#allocation9 + $0x1f0] sm:$0xff] }
  0x5f   :  { %223 = vmatmul.mubr.f32.gmra.mrb[2].mxu0 %v65_v47  ;;  %797 = vmatprep.subr.bf16.mxu1 %v796_v55  ;;  %v391_v51 = vld [vmem:[#allocation9 + $0x68] sm:$0xff]  ;;  %v422_v52 = vld [vmem:[#allocation9 + $0x160] sm:$0xff]  ;;  %v408_v55 = vld [vmem:[#allocation9 + $0xf0] sm:$0xff] }
  0x60   :  { %300 = vmatmul.mubr.f32.gmra.mrb[2].mxu1 %v65_v47  ;;  %v438_v47 = vld [vmem:[#allocation9 + $0x1e0] sm:$0xff]  ;;  %v423_v53 = vld [vmem:[#allocation9 + $0x168] sm:$0xff]  ;;  %v786_v54 = vpack.c.bf16 %v391_v51, %v390_v49  ;;  %v441_v0 = vld [vmem:[#allocation9 + $0x1f8] sm:$0xff] }
  0x61   :  { %767 = vmatpush3.bf16.msra.mxu0 %v766_v56  ;;  %v816_v50 = vpack.c.bf16 %v439_v48, %v438_v47  ;;  %v409_v56 = vld [vmem:[#allocation9 + $0xf8] sm:$0xff]  ;;  %v818_v58 = vpack.c.bf16 %v423_v53, %v422_v52  ;;  %v392_v60 = vld [vmem:[#allocation9 + $0x70] sm:$0xff] }
  0x62   :  { %799 = vmatpush3.bf16.msra.mxu1 %v798_v59  ;;  %769 = vmatprep.subr.bf16.mxu0 %v768_v62  ;;  %v788_v59 = vpack.c.bf16 %v409_v56, %v408_v55  ;;  %v393_v61 = vld [vmem:[#allocation9 + $0x78] sm:$0xff]  ;;  %v820_v62 = vpack.c.bf16 %v441_v0, %v440_v57  ;;  %v424_v63 = vld [vmem:[#allocation9 + $0x170] sm:$0xff] }
  0x63   :  { %801 = vmatprep.subr.bf16.mxu1 %v800_v3  ;;  %v425_v1 = vld [vmem:[#allocation9 + $0x178] sm:$0xff]  ;;  %v790_v2 = vpack.c.bf16 %v393_v61, %v392_v60 }
  0x64   :  { %v822_v3 = vpack.c.bf16 %v425_v1, %v424_v63 }
  0x65   :  { %771 = vmatpush3.bf16.msra.mxu0 %v770_v4  ;;  %v132_v4 = vlaneseq }
  0x66   :  { %803 = vmatpush3.bf16.msra.mxu1 %v802_v7  ;;  %773 = vmatprep.subr.bf16.mxu0 %v772_v11  ;;  %v130_v7 = vld [vmem:[%s1092_s3] sm:$0xf] }
  0x67   :  { %805 = vmatprep.subr.bf16.mxu1 %v804_v15  ;;  %v133_v5 = vshrl.u32 %v132_v4, 7 }
  0x69   :  { %775 = vmatpush3.bf16.msra.mxu0 %v774_v16  ;;  %v134_v6 = vsub.s32 0, %v133_v5  ;;  %v142_v8 = vsub.s32 2, %v133_v5  ;;  %v138_v9 = vsub.s32 1, %v133_v5  ;;  %v146_v10 = vsub.s32 3, %v133_v5 }
  0x6a   :  { %807 = vmatpush3.bf16.msra.mxu1 %v806_v19  ;;  %777 = vmatprep.subr.bf16.mxu0 %v776_v23 }
  0x6b   :  { %809 = vmatprep.subr.bf16.mxu1 %v808_v27  ;;  %v135_v11 = vrot.slane %v130_v7, %v134_v6  ;;  %v143_v12 = vrot.slane %v130_v7, %v142_v8  ;;  %v139_v13 = vrot.slane %v130_v7, %v138_v9  ;;  %v147_v14 = vrot.slane %v130_v7, %v146_v10 }
  0x6d   :  { %779 = vmatpush3.bf16.msra.mxu0 %v778_v28 }
  0x6e   :  { %811 = vmatpush3.bf16.msra.mxu1 %v810_v32  ;;  %781 = vmatprep.subr.bf16.mxu0 %v780_v36 }
  0x6f   :  { %813 = vmatprep.subr.bf16.mxu1 %v812_v37 }
  0x71   :  { %783 = vmatpush3.bf16.msra.mxu0 %v782_v41 }
  0x72   :  { %815 = vmatpush3.bf16.msra.mxu1 %v814_v45  ;;  %785 = vmatprep.subr.bf16.mxu0 %v784_v46 }
  0x73   :  { %817 = vmatprep.subr.bf16.mxu1 %v816_v50 }
  0x75   :  { %787 = vmatpush3.bf16.msra.mxu0 %v786_v54 }
  0x76   :  { %819 = vmatpush3.bf16.msra.mxu1 %v818_v58  ;;  %789 = vmatprep.subr.bf16.mxu0 %v788_v59 }
  0x77   :  { %821 = vmatprep.subr.bf16.mxu1 %v820_v62 }
  0x79   :  { %791 = vmatpush3.bf16.msra.mxu0 %v790_v2 }
  0x7a   :  { %823 = vmatpush3.bf16.msra.mxu1 %v822_v3 }
 0x12e   :  { %v218_v15 = vpop.f32.mrb[0].mxu0 }
 0x12f   :  { %v1036_v16 = vadd.f32 %v218_v15, %v135_v11  ;;  %v295_v17 = vpop.f32.mrb[0].mxu1  ;;  %v220_v18 = vpop.f32.mrb[1].mxu0 }
 0x130   :  { %v1038_v19 = vadd.f32 %v295_v17, %v143_v12  ;;  %v221_v20 = vadd.f32 %v220_v18, %v139_v13  ;;  %v297_v21 = vpop.f32.mrb[1].mxu1 }
 0x131   :  { %v314_v22 = vmul.f32 0.044715, %v1036_v16  ;;  %v1041_v23 = vadd.f32 %v297_v21, %v147_v14 }
 0x132   :  { %v316_v24 = vmul.f32 0.044715, %v1038_v19  ;;  %v315_v25 = vmul.f32 0.044715, %v221_v20  ;;  %v224_v26 = vpop.f32.mrb[2].mxu0 }
 0x133   :  { %v322_v27 = vmul.f32 %v314_v22, %v1036_v16  ;;  %v317_v28 = vmul.f32 0.044715, %v1041_v23  ;;  %v1046_v29 = vadd.f32 %v224_v26, %v135_v11  ;;  %v301_v30 = vpop.f32.mrb[2].mxu1  ;;  %v226_v31 = vpop.f32.mrb[3].mxu0  ;;  %v307_v11 = vmul.f32 0.5, %v221_v20 }
 0x134   :  { %v324_v32 = vmul.f32 %v316_v24, %v1038_v19  ;;  %v323_v33 = vmul.f32 %v315_v25, %v221_v20  ;;  %v1049_v34 = vadd.f32 %v301_v30, %v143_v12  ;;  %v227_v35 = vadd.f32 %v226_v31, %v139_v13  ;;  %v303_v36 = vpop.f32.mrb[3].mxu1 }
 0x135   :  { %v330_v37 = vmul.f32 %v322_v27, %v1036_v16  ;;  %v325_v38 = vmul.f32 %v317_v28, %v1041_v23  ;;  %v318_v39 = vmul.f32 0.044715, %v1046_v29  ;;  %v304_v40 = vadd.f32 %v303_v36, %v147_v14 }
 0x136   :  { %v332_v41 = vmul.f32 %v324_v32, %v1038_v19  ;;  %v320_v42 = vmul.f32 0.044715, %v1049_v34  ;;  %v319_v43 = vmul.f32 0.044715, %v227_v35  ;;  %v331_v44 = vmul.f32 %v323_v33, %v221_v20 }
 0x137   :  { %v338_v45 = vadd.f32 %v330_v37, %v1036_v16  ;;  %v321_v46 = vmul.f32 0.044715, %v304_v40  ;;  %v326_v48 = vmul.f32 %v318_v39, %v1046_v29  ;;  %v333_v54 = vmul.f32 %v325_v38, %v1041_v23 }
 0x138   :  { %v340_v47 = vadd.f32 %v332_v41, %v1038_v19  ;;  %v327_v49 = vmul.f32 %v319_v43, %v227_v35  ;;  %v339_v50 = vadd.f32 %v331_v44, %v221_v20  ;;  %v328_v52 = vmul.f32 %v320_v42, %v1049_v34  ;;  %v619_v42 = vld [vmem:[%s1094_s5] ss:$0 sm:$0xff]  ;;  %s915_s5 = scalar_lea.vmem %s607_s12, 256 }
 0x139   :  { %v346_v51 = vmul.f32 0.7978846, %v338_v45  ;;  %v329_v53 = vmul.f32 %v321_v46, %v304_v40  ;;  %v341_v58 = vadd.f32 %v333_v54, %v1041_v23  ;;  %v334_v60 = vmul.f32 %v326_v48, %v1046_v29  ;;  %p916_p10 = scmp.ne.s32.totalorder %s607_s12, %s915_s5  ;;  %p921_p12 = scmp.lt.s32.totalorder %s915_s5, %s915_s5 }
 0x13a   :  { %v348_v55 = vmul.f32 0.7978846, %v340_v47  ;;  %v347_v56 = vmul.f32 0.7978846, %v339_v50  ;;  %v335_v57 = vmul.f32 %v327_v49, %v227_v35  ;;  %v336_v63 = vmul.f32 %v328_v52, %v1049_v34 }
 0x13b   :  { %833 = vtanh.f32 %v346_v51  ;;  %v337_v59 = vmul.f32 %v329_v53, %v304_v40  ;;  %v349_v61 = vmul.f32 0.7978846, %v341_v58  ;;  %v342_v2 = vadd.f32 %v334_v60, %v1046_v29  ;;  %p922_p13 = por %p921_p12, %p920_p11 }
 0x13c   :  { %835 = vtanh.f32 %v348_v55  ;;  %v343_v0 = vadd.f32 %v335_v57, %v227_v35  ;;  %v344_v4 = vadd.f32 %v336_v63, %v1049_v34  ;;  %v306_v14 = vmul.f32 0.5, %v1036_v16 }
 0x13d   :  { %837 = vtanh.f32 %v347_v56  ;;  %v345_v62 = vadd.f32 %v337_v59, %v304_v40  ;;  %v350_v5 = vmul.f32 0.7978846, %v342_v2  ;;  %v309_v21 = vmul.f32 0.5, %v1041_v23  ;;  %p923_p0 = pnand %p922_p13, %p916_p10 }
 0x13e   :  { %v351_v1 = vmul.f32 0.7978846, %v343_v0  ;;  %839 = vtanh.f32 %v349_v61  ;;  %v352_v6 = vmul.f32 0.7978846, %v344_v4  ;;  %v308_v25 = vmul.f32 0.5, %v1038_v19 }
 0x13f   :  { %v353_v3 = vmul.f32 0.7978846, %v345_v62  ;;  %v311_v27 = vmul.f32 0.5, %v227_v35  ;;  %v313_v20 = vmul.f32 0.5, %v304_v40  ;;  %v310_v37 = vmul.f32 0.5, %v1046_v29 }
 0x140   :  { %841 = vtanh.f32 %v351_v1  ;;  %v312_v35 = vmul.f32 0.5, %v1049_v34 }
 0x141   :  { %843 = vtanh.f32 %v353_v3 }
 0x142   :  { %845 = vtanh.f32 %v350_v5 }
 0x143   :  { %847 = vtanh.f32 %v352_v6 }
 0x145   :  { %v834_v7 = vpop.eup %833 }
 0x146   :  { %v836_v8 = vpop.eup %835  ;;  %v362_v10 = vadd.f32 1.0, %v834_v7 }
 0x147   :  { %v838_v9 = vpop.eup %837  ;;  %v364_v15 = vadd.f32 1.0, %v836_v8 }
 0x148   :  { %v363_v12 = vadd.f32 1.0, %v838_v9  ;;  %v840_v13 = vpop.eup %839  ;;  %v370_v26 = vmul.f32 %v362_v10, %v306_v14 }
 0x149   :  { %v365_v22 = vadd.f32 1.0, %v840_v13  ;;  %v372_v16 = vmul.f32 %v364_v15, %v308_v25 }
 0x14a   :  { %v842_v17 = vpop.eup %841  ;;  %v371_v18 = vmul.f32 %v363_v12, %v307_v11 }
 0x14b   :  { %v844_v24 = vpop.eup %843  ;;  %v367_v28 = vadd.f32 1.0, %v842_v17  ;;  %v373_v31 = vmul.f32 %v365_v22, %v309_v21 }
 0x14c   :  { %v846_v30 = vpop.eup %845  ;;  %513 = vmatprep.mubr.f32.mxu0 %v371_v18  ;;  %v369_v32 = vadd.f32 1.0, %v844_v24 }
 0x14d   :  { %v848_v33 = vpop.eup %847  ;;  %514 = vmatmul.mubr.f32.vlgmr.msra.gmra.mrb[4].mxu0 %v370_v26  ;;  %v375_v36 = vmul.f32 %v367_v28, %v311_v27  ;;  %v366_v38 = vadd.f32 1.0, %v846_v30  ;;  %588 = vmatprep.mubr.f32.mxu1 %v373_v31 }
 0x14e   :  { %v377_v23 = vmul.f32 %v369_v32, %v313_v20  ;;  %v368_v39 = vadd.f32 1.0, %v848_v33  ;;  %589 = vmatmul.mubr.f32.vlgmr.msra.gmra.mrb[4].mxu1 %v372_v16 }
 0x14f   :  { %518 = vmatprep.mubr.f32.mxu0 %v375_v36  ;;  %v374_v19 = vmul.f32 %v366_v38, %v310_v37 }
 0x150   :  { %593 = vmatprep.mubr.f32.mxu1 %v377_v23  ;;  %v376_v41 = vmul.f32 %v368_v39, %v312_v35 }
 0x151   :  { %519 = vmatmul.mubr.f32.gmra.mrb[6].mxu0 %v374_v19 }
 0x152   :  { %594 = vmatmul.mubr.f32.gmra.mrb[6].mxu1 %v376_v41 }
 0x220   :  { %v652_v40 = vpop.f32.mrb[4].mxu0 }
 0x221   :  { %v653_v43 = vpop.f32.mrb[5].mxu0  ;;  %v690_v29 = vpop.f32.mrb[4].mxu1 }
 0x222   :  { %v654_v44 = vadd.f32 %v653_v43, %v652_v40  ;;  %v691_v45 = vpop.f32.mrb[5].mxu1 }
 0x223   :  { %v692_v47 = vadd.f32 %v691_v45, %v690_v29 }
 0x224   :  { %v516_v46 = vadd.f32 %v654_v44, %v619_v42  ;;  %v655_v48 = vpop.f32.mrb[6].mxu0 }
 0x225   :  { %v656_v49 = vpop.f32.mrb[7].mxu0  ;;  %v693_v51 = vpop.f32.mrb[6].mxu1 }
 0x226   :  { %v591_v50 = vadd.f32 %v692_v47, %v516_v46  ;;  %v657_v34 = vadd.f32 %v656_v49, %v655_v48  ;;  %v694_v52 = vpop.f32.mrb[7].mxu1 }
 0x227   :  { %v695_v54 = vadd.f32 %v694_v52, %v693_v51 }
 0x228   :  { %599 = vst [vmem:[#allocation10] sm:$0xff] %v591_v50  ;;  %v521_v53 = vadd.f32 %v657_v34, %v619_v42 }
 0x22a   :  { %v596_v55 = vadd.f32 %v695_v54, %v521_v53 }
 0x22c   :  { %600 = vst [vmem:[#allocation10 + $0x8] sm:$0xff] %v596_v55 }
 0x22d   :  { %926 = shalt.err (!%p923_p0)
}
 0x22e   :  { %s927_s15 = scalar_lea.hbm %s1095_s6, 256 }
 0x22f   :  { %p928_p1 = scmp.ne.s32.totalorder %s1095_s6, %s927_s15  ;;  %p931_p2 = scmp.lt.u32.totalorder %s927_s15, %s1095_s6 }
 0x231   :  { %p933_p3 = pnand %p931_p2, %p928_p1 }
 0x233   :  { %936 = shalt.err (!%p933_p3)
}
 0x234   :  { %612 = dma.vmem_to_hbm [thread:$0]  %s607_s12, 256, %s1095_s6, [#allocation6], %s947_s2, %s947_s2, %s948_s20  }
 0x235   :  { %941 = dma.done.wait [#allocation6], 256  }
 0x236   :  { %942 = vsyncadd [#allocation6], 4294967040 }
 0x237   :  { %616 = vsyncpa [#allocation5], 1 }
 0x238   :  { %617 = vsyncpa [#allocation8], 1 }
 0x239   :  { %618 = vsyncpa [#allocation6], 1 }

</bundles_post_ra>
